<compile_context>
chip_gen: v6e
topology: v6e:2x2x1
jax: 0.10.0
libtpu: 0.0.40
codegen_flags: <defaults>
</compile_context>

<pallas_src>
import jax
import jax.numpy as jnp
from jax.experimental import pallas as pl
from jax.experimental.pallas import tpu as pltpu

_SUBLANE = 8


def _round_up(n, m):
    return ((n + m - 1) // m) * m


def _affine_kernel(x_ref, w_ref, b_ref, o_ref):
    """One batch tile of: out = x @ W_eff + b_eff (f32 accumulate + epilogue)."""
    x = x_ref[...].astype(w_ref.dtype)              # cast activations to MXU dtype
    y = jnp.dot(x, w_ref[...], preferred_element_type=jnp.float32)
    y = y + b_ref[...].astype(jnp.float32)          # (1, out) broadcast over rows
    o_ref[...] = y.astype(o_ref.dtype)


def init_top_mlp_layers(key, hn_list, dtype=jnp.float32):
    """Per-layer params matching nn.Linear shapes/init (weight [out,in], bias [out])."""
    layers = []
    for in_num, out_num in zip(hn_list[:-1], hn_list[1:]):
        key, kw, kb = jax.random.split(key, 3)
        bound = 1.0 / float(in_num) ** 0.5
        w = jax.random.uniform(kw, (out_num, in_num), dtype, -bound, bound)
        b = jax.random.uniform(kb, (out_num,), dtype, -bound, bound)
        layers.append(dict(w=w, b=b, in_num=in_num, out_num=out_num,
                           residual=(in_num == out_num)))
    return layers


def collapse_top_mlp(layers, compute_dtype=jnp.float32):
    """Fold the purely-affine layer stack into a single (W_eff, b_eff).

    y = x @ (W.T + I*residual) + b per layer composes into one affine map
    because there is no activation in the module.  Weights may be cast to
    bf16 for the MXU; the bias stays f32 (it is added in the f32 epilogue).
    """
    in0 = layers[0]["in_num"]
    w_eff = jnp.eye(in0, dtype=jnp.float32)
    b_eff = jnp.zeros((1, in0), jnp.float32)
    for p in layers:
        m = p["w"].T.astype(jnp.float32)
        if p["residual"]:
            m = m + jnp.eye(p["in_num"], dtype=jnp.float32)
        w_eff = w_eff @ m
        b_eff = b_eff @ m + p["b"].astype(jnp.float32)[None, :]
    return dict(w_eff=w_eff.astype(compute_dtype), b_eff=b_eff)


def top_mlp_forward(x, fused, *, tb=512):
    """Whole TopMLP forward as one batch-tiled pallas_call."""
    B, in_f = x.shape
    w_eff, b_eff = fused["w_eff"], fused["b_eff"]
    out_f = w_eff.shape[1]

    # Batch tile: multiple of 8 sublanes, clamped to the (rounded-up) batch.
    tb = max(_SUBLANE, min(tb, _round_up(B, _SUBLANE)))
    grid = (pl.cdiv(B, tb),)

    itemsize = x.dtype.itemsize
    cost = pl.CostEstimate(
        flops=2 * B * in_f * out_f,
        transcendentals=0,
        bytes_accessed=(B * in_f * itemsize + B * out_f * itemsize
                        + w_eff.size * w_eff.dtype.itemsize
                        + b_eff.size * b_eff.dtype.itemsize),
    )

    return pl.pallas_call(
        _affine_kernel,
        out_shape=jax.ShapeDtypeStruct((B, out_f), x.dtype),
        grid=grid,
        in_specs=[
            # Activations: true feature width (block dim == full array dim is
            # legal), tiled over the batch only -> no wrapper pad/slice pass.
            pl.BlockSpec((tb, in_f), lambda i: (i, 0)),
            # Weights / bias: full-array VMEM residents across the grid.
            pl.BlockSpec((in_f, out_f), lambda i: (0, 0)),
            pl.BlockSpec((1, out_f), lambda i: (0, 0)),
        ],
        out_specs=pl.BlockSpec((tb, out_f), lambda i: (i, 0)),
        compiler_params=pltpu.CompilerParams(
            dimension_semantics=("parallel",)),   # v7x: shard batch over 2 TCs
        cost_estimate=cost,
    )(x, w_eff, b_eff)


def top_mlp_reference(x, layers):
    """Plain-JAX, layer-by-layer mirror of the PyTorch forward."""
    x = x.astype(jnp.float32)
    for p in layers:
        res = x if p["residual"] else 0.0
        x = x @ p["w"].T + p["b"] + res
    return x


if __name__ == "__main__":
    key = jax.random.PRNGKey(0)
    hn_list = [32, 32, 64, 64, 32]   # 32->32(res), 32->64, 64->64(res), 64->32
    B = 8

    k_x, k_p = jax.random.split(key)
    x = jax.random.normal(k_x, (B, hn_list[0]), jnp.float32)
    layers = init_top_mlp_layers(k_p, hn_list)
    ref = top_mlp_reference(x, layers)

    # f32 path (exact vs. the layer-by-layer reference up to f32 reassociation).
    out = jax.block_until_ready(top_mlp_forward(x, collapse_top_mlp(layers)))
    assert out.shape == ref.shape, (out.shape, ref.shape)
    assert jnp.allclose(out, ref, atol=1e-4, rtol=1e-4), "f32 mismatch vs reference"

    # bf16 weights (v6e/v7x MXU-native), f32 accumulation -> looser tolerance.
    out_bf16 = jax.block_until_ready(
        top_mlp_forward(x, collapse_top_mlp(layers, jnp.bfloat16)))
    assert out_bf16.shape == ref.shape
    assert jnp.allclose(out_bf16, ref, atol=1e-1, rtol=1e-1), "bf16 mismatch vs reference"

    print("KERNEL_OK")
</pallas_src>

<mosaic_0001>
module attributes {stable_mosaic.version = 11 : i64} {
  func.func @_affine_kernel(%arg0: i32, %arg1: memref<8x32xf32, #tpu.memory_space<vmem>>, %arg2: memref<32x32xf32, #tpu.memory_space<vmem>>, %arg3: memref<1x32xf32, #tpu.memory_space<vmem>>, %arg4: memref<8x32xf32, #tpu.memory_space<vmem>>) attributes {dimension_semantics = [#tpu.dimension_semantics<parallel>], iteration_bounds = array<i64: 1>, scalar_prefetch = 0 : i64, scratch_operands = 0 : i64, tpu.core_type = #tpu.core_type<tc>, window_params = [{transform_indices = @transform_0, window_bounds = array<i64: 8, 32>}, {pipeline_mode = #tpu.pipeline_mode<synchronous>, transform_indices = @transform_1, window_bounds = array<i64: 32, 32>}, {pipeline_mode = #tpu.pipeline_mode<synchronous>, transform_indices = @transform_2, window_bounds = array<i64: 1, 32>}, {transform_indices = @transform_3, window_bounds = array<i64: 8, 32>}]} {
    %c0 = arith.constant 0 : index
    %c0_0 = arith.constant 0 : index
    %0 = vector.load %arg1[%c0, %c0_0] : memref<8x32xf32, #tpu.memory_space<vmem>>, vector<8x32xf32>
    %c0_1 = arith.constant 0 : index
    %c0_2 = arith.constant 0 : index
    %1 = vector.load %arg2[%c0_1, %c0_2] : memref<32x32xf32, #tpu.memory_space<vmem>>, vector<32x32xf32>
    %cst = arith.constant dense<0.000000e+00> : vector<8x32xf32>
    %2 = tpu.matmul %0, %1, %cst {dimension_numbers = #tpu.dot_dimension_numbers<[1], [0], [0], [1], [0, 0, 1, 1], [], []>} : vector<8x32xf32>, vector<32x32xf32>, vector<8x32xf32> -> vector<8x32xf32>
    %c0_3 = arith.constant 0 : index
    %c0_4 = arith.constant 0 : index
    %3 = vector.load %arg3[%c0_3, %c0_4] : memref<1x32xf32, #tpu.memory_space<vmem>>, vector<1x32xf32>
    %4 = vector.broadcast %3 : vector<1x32xf32> to vector<8x32xf32>
    %5 = arith.addf %2, %4 : vector<8x32xf32>
    %c0_5 = arith.constant 0 : index
    %c0_6 = arith.constant 0 : index
    %6 = vector.load %arg4[%c0_5, %c0_6] : memref<8x32xf32, #tpu.memory_space<vmem>>, vector<8x32xf32>
    tpu.vector_store %arg4[%c0_5, %c0_6], %5 {strides = array<i32>} : memref<8x32xf32, #tpu.memory_space<vmem>>, vector<8x32xf32>,
    return
  }
  func.func @transform_0(%arg0: i32) -> (i32, i32) {
    %c0_i32 = arith.constant 0 : i32
    %c0_i32_0 = arith.constant 0 : i32
    return %arg0, %c0_i32 : i32, i32
  }
  func.func @transform_1(%arg0: i32) -> (i32, i32) {
    %c0_i32 = arith.constant 0 : i32
    %c0_i32_0 = arith.constant 0 : i32
    %c0_i32_1 = arith.constant 0 : i32
    return %c0_i32, %c0_i32_0 : i32, i32
  }
  func.func @transform_2(%arg0: i32) -> (i32, i32) {
    %c0_i32 = arith.constant 0 : i32
    %c0_i32_0 = arith.constant 0 : i32
    %c0_i32_1 = arith.constant 0 : i32
    return %c0_i32, %c0_i32_0 : i32, i32
  }
  func.func @transform_3(%arg0: i32) -> (i32, i32) {
    %c0_i32 = arith.constant 0 : i32
    %c0_i32_0 = arith.constant 0 : i32
    return %arg0, %c0_i32 : i32, i32
  }
}

</mosaic_0001>

<bundles_post_ra>
// kernel: tpu_custom_call.1
= control target key start
LH: loop header
LB: loop body
LE: loop exit
PB: predicated region body
PF: predicated region fallthrough
CT: control target
= control target key end

     0   :  { %8 = vsyncpa [#allocation3], 0  ;;  %s274_s0 = inlined_call_operand.hbm [shape: f32[8,32], index: 0, kind: input, shape index: {}]   ;;  %s275_s1 = inlined_call_operand.hbm [shape: f32[32,32], index: 1, kind: input, shape index: {}]   ;;  %s276_s2 = inlined_call_operand.vmem [shape: f32[1,32], index: 2, kind: input, shape index: {}]   ;;  %s277_s3 = inlined_call_operand.hbm [shape: f32[8,32], index: 3, kind: output, shape index: {}]  }
   0x1   :  { %9 = vsyncpa [#allocation6], 0 }
   0x2   :  { %10 = vsyncpa [#allocation4], 0  ;;  %s235_s12 = smov [#allocation2]   ;;  %s236_s14 = smov [#allocation5]  }
   0x3   :  { %s17_s13 = sshll.u32 %s235_s12, 4  ;;  %s26_s15 = sshll.u32 %s236_s14, 4  ;;  %s18_s13 = int_to_ptr.vmem [resolvable:$true] %s17_s13  ;;  %s27_s15 = int_to_ptr.vmem [resolvable:$true] %s26_s15 }
   0x4   :  { %s177_s16 = scalar_lea.vmem %s18_s13, 128  ;;  %p182_p1 = scmp.lt.s32.totalorder %s18_s13, %s18_s13 }
   0x5   :  { %p178_p0 = scmp.ne.s32.totalorder %s18_s13, %s177_s16  ;;  %p183_p2 = scmp.lt.s32.totalorder %s177_s16, %s177_s16 }
   0x7   :  { %p184_p3 = por %p183_p2, %p182_p1 }
   0x9   :  { %p185_p4 = pnand %p184_p3, %p178_p0 }
   0xb   :  { %188 = shalt.err (!%p185_p4)
}
   0xc   :  { %20 = dma.hbm_to_vmem [thread:$0]  %s274_s0, 128, %s18_s13, [#allocation3]  }
   0xd   :  { %s197_s19 = scalar_lea.vmem %s27_s15, 512  ;;  %p202_p6 = scmp.lt.s32.totalorder %s27_s15, %s27_s15 }
   0xe   :  { %p198_p5 = scmp.ne.s32.totalorder %s27_s15, %s197_s19  ;;  %p203_p7 = scmp.lt.s32.totalorder %s197_s19, %s197_s19 }
  0x10   :  { %p204_p8 = por %p203_p7, %p202_p6 }
  0x12   :  { %p205_p9 = pnand %p204_p8, %p198_p5 }
  0x14   :  { %208 = shalt.err (!%p205_p9)
}
  0x15   :  { %s237_s20 = smov 128   ;;  %s238_s21 = smov 8  }
  0x16   :  { %32 = dma.hbm_to_vmem [thread:$0]  %s275_s1, 512, %s27_s15, [#allocation6], %s237_s20, %s237_s20, %s238_s21  }
  0x17   :  { %229 = dma.done.wait [#allocation3], 128  }
  0x18   :  { %230 = vsyncadd [#allocation3], 4294967168 }
  0x19   :  { %231 = dma.done.wait [#allocation6], 512  }
  0x1a   :  { %232 = vsyncadd [#allocation6], 4294966784  ;;  %v239_v0 = vmov 0.0   ;;  %vm240_vm0 = vmmov 0   ;;  %v45_v1 = vld [vmem:[#allocation5 + $0x18] sm:$0xff]  ;;  %v44_v2 = vld [vmem:[#allocation5 + $0x10] sm:$0xff] }
  0x1b   :  { %151 = vmatprep.subr.mxu0 %v239_v0  ;;  %159 = vmatprep.mubr.msk.f32.mxu0 %vm240_vm0, %v239_v0  ;;  %v43_v3 = vld [vmem:[#allocation5 + $0x8] sm:$0xff]  ;;  %v42_v4 = vld [vmem:[#allocation5] sm:$0xff]  ;;  %v41_v5 = vld [vmem:[#allocation2] sm:$0xff]  ;;  %vm53_vm1 = vcmask 261120   ;;  %s241_s24 = smov [#allocation7]  }
  0x1c   :  { %152 = vmatpush3.msra.mxu0 %v45_v1  ;;  %v144_v6 = vld [vmem:[%s276_s2] ss:$0 sm:$0xff]  ;;  %s134_s25 = sshll.u32 %s241_s24, 4  ;;  %s135_s25 = int_to_ptr.vmem [resolvable:$true] %s134_s25 }
  0x1d   :  { %153 = vmatprep.subr.mxu0 %v239_v0  ;;  %s209_s26 = scalar_lea.vmem %s135_s25, 128  ;;  %p214_p11 = scmp.lt.s32.totalorder %s135_s25, %s135_s25 }
  0x1e   :  { %154 = vmatpush3.msra.mxu0 %v44_v2  ;;  %p210_p10 = scmp.ne.s32.totalorder %s135_s25, %s209_s26  ;;  %p215_p12 = scmp.lt.s32.totalorder %s209_s26, %s209_s26 }
  0x1f   :  { %155 = vmatprep.subr.mxu0 %v239_v0 }
  0x20   :  { %156 = vmatpush3.msra.mxu0 %v43_v3  ;;  %p216_p13 = por %p215_p12, %p214_p11 }
  0x21   :  { %157 = vmatprep.subr.mxu0 %v239_v0 }
  0x22   :  { %158 = vmatpush3.msra.mxu0 %v42_v4  ;;  %p217_p0 = pnand %p216_p13, %p210_p10 }
  0x23   :  { %160 = vmatmul.mubr.msk.f32.vlgmr.msra.gmra.mxu0 %vm53_vm1, %v41_v5 }
  0xe3   :  { %v123_v7 = vpop.f32.mrf.mxu0 }
  0xe4   :  { %v124_v8 = vadd.f32 %v144_v6, %v123_v7 }
  0xe5   :  { %v161_v9 = vpop.f32.mrf.mxu0 }
  0xe6   :  { %127 = vst.msk [vmem:[#allocation7] sm:$0xff] %vm53_vm1, %v124_v8 }
  0xe7   :  { %220 = shalt.err (!%p217_p0)
}
  0xe8   :  { %137 = dma.vmem_to_hbm [thread:$0]  %s135_s25, 128, %s277_s3, [#allocation4]  }
  0xe9   :  { %233 = dma.done.wait [#allocation4], 128  }
  0xea   :  { %234 = vsyncadd [#allocation4], 4294967168 }
  0xeb   :  { %141 = vsyncpa [#allocation3], 1 }
  0xec   :  { %142 = vsyncpa [#allocation6], 1 }
  0xed   :  { %143 = vsyncpa [#allocation4], 1 }

</bundles_post_ra>
